<compile_context>
chip_gen: v5e
topology: v5e:2x2
jax: 0.10.0
libtpu: 0.0.40
codegen_flags: <defaults>
</compile_context>

<pallas_src>
import jax
import jax.numpy as jnp
from jax.experimental import pallas as pl
from jax.experimental.pallas import tpu as pltpu  # noqa: F401  (kept for parity)


# ----------------------------- fused kernel ---------------------------------
def make_fused_rnn_kernel(num_layers, seq, batch_pad, in_dim, hidden):
    L, bp, H = num_layers, batch_pad, hidden
    steps = seq + L - 1  # wavefront steps

    def kernel(x_ref, wbig_ref, misc_ref, out_ref):
        x = x_ref[...]          # (seq*bp, in_dim)
        wbig = wbig_ref[...]    # (L*H, L*H) block-bidiagonal recurrence weight
        misc = misc_ref[...]    # (in_dim + L + 2, H): [Wih0; b_0..b_{L-1}; fc_w; fc_b]

        w_ih0 = misc[0:in_dim, :]
        biases = [misc[in_dim + l:in_dim + l + 1, :] for l in range(L)]
        fc_w = misc[in_dim + L:in_dim + L + 1, :]
        fc_b = misc[in_dim + L + 1:in_dim + L + 2, 0:1]

        # Layer-0 input projection for ALL timesteps: one MXU matmul, off the
        # serial chain.
        xw0 = jnp.dot(x, w_ih0, preferred_element_type=jnp.float32) + biases[0]

        # Additive slab for the whole wavefront, precomputed & (8,*)-aligned:
        #   column block 0   : xw0[t] for wavefront step t < seq, else 0
        #   column block l>0 : b_l for step >= l (zero before layer l warms up)
        if L > 1:
            col0 = jnp.concatenate(
                [xw0, jnp.zeros(((L - 1) * bp, H), jnp.float32)], axis=0)
        else:
            col0 = xw0
        cols = [col0]
        for l in range(1, L):
            cols.append(jnp.concatenate(
                [jnp.zeros((l * bp, H), jnp.float32),
                 jnp.broadcast_to(biases[l], ((steps - l) * bp, H))], axis=0))
        addend = jnp.concatenate(cols, axis=1) if L > 1 else cols[0]
        # addend: (steps*bp, L*H)

        # Wavefront recurrence: 1 matmul + 1 add + 1 tanh per step, fully
        # unrolled (steps is tiny and static).
        h = jnp.zeros((bp, L * H), jnp.float32)
        h_fin = [None] * L
        for s in range(steps):
            h = jnp.tanh(
                jnp.dot(h, wbig, preferred_element_type=jnp.float32)
                + addend[s * bp:(s + 1) * bp, :])
            for l in range(L):
                if s == seq - 1 + l:  # layer l finishes at wavefront step seq-1+l
                    h_fin[l] = h[:, l * H:(l + 1) * H]

        # fc = Linear(H, 1) on h_n (layer-major) as one lane reduction + store.
        h_n = jnp.concatenate(h_fin, axis=0)                  # (L*bp, H)
        out_ref[...] = jnp.sum(h_n * fc_w, axis=-1, keepdims=True) + fc_b

    return kernel


# ------------------------------ wrapper --------------------------------------
def rnn_forward(x, params):
    """x: (batch, seq, input_size), batch_first=True like the PyTorch module.
    Returns out: (num_layers * batch, 1, 1)."""
    batch, seq, in_dim = x.shape
    layers = params["rnn_layers"]
    L = len(layers)
    H = params["fc_w"].shape[1]
    bp = max(8, ((batch + 7) // 8) * 8)   # pad batch to full sublane groups

    # Pad batch, go time-major, flatten into one slab for the hoisted matmul.
    x_pad = jnp.zeros((bp, seq, in_dim), x.dtype).at[:batch].set(x)
    x_flat = jnp.transpose(x_pad, (1, 0, 2)).reshape(seq * bp, in_dim)

    # Stacked block-bidiagonal recurrence weight:
    #   block (i, i)   = Whh_i
    #   block (i, i+1) = Wih_{i+1}   (deep layer i+1 reads h_i)
    zeros_hh = jnp.zeros((H, H), jnp.float32)
    rows = []
    for i in range(L):
        blocks = []
        for j in range(L):
            if i == j:
                blocks.append(layers[j][1])     # Whh_j
            elif i == j - 1:
                blocks.append(layers[j][0])     # Wih_j (j >= 1, shape (H, H))
            else:
                blocks.append(zeros_hh)
        rows.append(jnp.concatenate(blocks, axis=1))
    wbig = jnp.concatenate(rows, axis=0)        # (L*H, L*H)

    # Misc slab: [Wih0 ; b_0 .. b_{L-1} ; fc_w ; fc_b(row, col 0)].
    misc_rows = [layers[0][0]]
    misc_rows += [layers[l][2] for l in range(L)]
    misc_rows += [params["fc_w"]]
    misc_rows += [jnp.zeros((1, H), jnp.float32).at[0, 0].set(params["fc_b"][0, 0])]
    misc = jnp.concatenate(misc_rows, axis=0)   # (in_dim + L + 2, H)

    steps = seq + L - 1
    cost = pl.CostEstimate(
        flops=(2 * seq * bp * in_dim * H
               + 2 * steps * bp * (L * H) * (L * H)
               + 2 * L * bp * H),
        transcendentals=steps * bp * L * H,
        bytes_accessed=4 * (x_flat.size + wbig.size + misc.size + L * bp))

    out = pl.pallas_call(
        make_fused_rnn_kernel(L, seq, bp, in_dim, H),
        out_shape=jax.ShapeDtypeStruct((L * bp, 1), jnp.float32),
        in_specs=[pl.BlockSpec(x_flat.shape, lambda: (0, 0)),
                  pl.BlockSpec(wbig.shape, lambda: (0, 0)),
                  pl.BlockSpec(misc.shape, lambda: (0, 0))],
        out_specs=pl.BlockSpec((L * bp, 1), lambda: (0, 0)),
        cost_estimate=cost,
    )(x_flat, wbig, misc)

    # Drop padded batch rows; layer-major like torch h_n.view(-1, 1, H) -> fc.
    return out.reshape(L, bp, 1)[:, :batch, :].reshape(L * batch, 1, 1)


# ------------------------------ params ---------------------------------------
def init_params(key, input_size, hidden_size, num_layers):
    """Shapes matching nn.RNN / nn.Linear.  W_ih stored as (in_dim, hidden),
    W_hh as (hidden, hidden); b_ih + b_hh fused into one (1, hidden) bias.
    fc weight stored as (1, hidden), fc bias as (1, 1)."""
    k = 1.0 / jnp.sqrt(hidden_size)
    layers = []
    for layer in range(num_layers):
        in_dim = input_size if layer == 0 else hidden_size
        key, k1, k2, k3, k4 = jax.random.split(key, 5)
        w_ih = jax.random.uniform(k1, (in_dim, hidden_size), jnp.float32, -k, k)
        w_hh = jax.random.uniform(k2, (hidden_size, hidden_size), jnp.float32, -k, k)
        b_ih = jax.random.uniform(k3, (hidden_size,), jnp.float32, -k, k)
        b_hh = jax.random.uniform(k4, (hidden_size,), jnp.float32, -k, k)
        layers.append((w_ih, w_hh, (b_ih + b_hh).reshape(1, hidden_size)))
    key, k5, k6 = jax.random.split(key, 3)
    kf = 1.0 / jnp.sqrt(hidden_size)
    fc_w = jax.random.uniform(k5, (1, hidden_size), jnp.float32, -kf, kf)
    fc_b = jax.random.uniform(k6, (1, 1), jnp.float32, -kf, kf)
    return {"rnn_layers": layers, "fc_w": fc_w, "fc_b": fc_b}


# -------------------------------- main ----------------------------------------
if __name__ == "__main__":
    batch, seq, input_size, hidden_size, num_layers = 2, 8, 16, 32, 2

    key = jax.random.PRNGKey(0)
    kp, kx = jax.random.split(key)
    params = init_params(kp, input_size, hidden_size, num_layers)
    x = jax.random.normal(kx, (batch, seq, input_size), jnp.float32)

    out = jax.jit(rnn_forward)(x, params)
    jax.block_until_ready(out)
    assert out.shape == (num_layers * batch, 1, 1)

    # Pure-JAX reference of the recurrence + fc (matches the torch forward).
    def ref(x, params):
        xt = jnp.transpose(x, (1, 0, 2))
        h_fins = []
        inp = xt
        for (w_ih, w_hh, b) in params["rnn_layers"]:
            h = jnp.zeros((x.shape[0], hidden_size), jnp.float32)
            ys = []
            for t in range(inp.shape[0]):
                h = jnp.tanh(inp[t] @ w_ih + h @ w_hh + b)
                ys.append(h)
            inp = jnp.stack(ys, 0)
            h_fins.append(h)
        h_n = jnp.stack(h_fins, 0).reshape(-1, hidden_size)
        return (h_n @ params["fc_w"].T + params["fc_b"]).reshape(-1, 1, 1)

    ref_out = ref(x, params)
    assert jnp.allclose(out, ref_out, atol=1e-5, rtol=1e-5)

    print("KERNEL_OK")
</pallas_src>

<mosaic_0001>
module attributes {stable_mosaic.version = 11 : i64} {
  func.func @kernel(%arg0: memref<64x16xf32, #tpu.memory_space<vmem>>, %arg1: memref<64x64xf32, #tpu.memory_space<vmem>>, %arg2: memref<20x32xf32, #tpu.memory_space<vmem>>, %arg3: memref<16x1xf32, #tpu.memory_space<vmem>>) attributes {dimension_semantics = [], scalar_prefetch = 0 : i64, scratch_operands = 0 : i64, tpu.core_type = #tpu.core_type<tc>} {
    %c0 = arith.constant 0 : index
    %c0_0 = arith.constant 0 : index
    %0 = vector.load %arg0[%c0, %c0_0] : memref<64x16xf32, #tpu.memory_space<vmem>>, vector<64x16xf32>
    %c0_1 = arith.constant 0 : index
    %c0_2 = arith.constant 0 : index
    %1 = vector.load %arg1[%c0_1, %c0_2] : memref<64x64xf32, #tpu.memory_space<vmem>>, vector<64x64xf32>
    %c0_3 = arith.constant 0 : index
    %c0_4 = arith.constant 0 : index
    %2 = vector.load %arg2[%c0_3, %c0_4] : memref<20x32xf32, #tpu.memory_space<vmem>>, vector<20x32xf32>
    %3 = vector.extract_strided_slice %2 {offsets = [0, 0], sizes = [16, 32], strides = [1, 1]} : vector<20x32xf32> to vector<16x32xf32>
    %4 = vector.extract_strided_slice %2 {offsets = [16, 0], sizes = [1, 32], strides = [1, 1]} : vector<20x32xf32> to vector<1x32xf32>
    %5 = vector.extract_strided_slice %2 {offsets = [17, 0], sizes = [1, 32], strides = [1, 1]} : vector<20x32xf32> to vector<1x32xf32>
    %6 = vector.extract_strided_slice %2 {offsets = [18, 0], sizes = [1, 32], strides = [1, 1]} : vector<20x32xf32> to vector<1x32xf32>
    %7 = vector.extract_strided_slice %2 {offsets = [19, 0], sizes = [1, 1], strides = [1, 1]} : vector<20x32xf32> to vector<1x1xf32>
    %cst = arith.constant dense<0.000000e+00> : vector<64x32xf32>
    %8 = tpu.matmul %0, %3, %cst {dimension_numbers = #tpu.dot_dimension_numbers<[1], [0], [0], [1], [0, 0, 1, 1], [], []>} : vector<64x16xf32>, vector<16x32xf32>, vector<64x32xf32> -> vector<64x32xf32>
    %9 = vector.broadcast %4 : vector<1x32xf32> to vector<64x32xf32>
    %10 = arith.addf %8, %9 : vector<64x32xf32>
    %cst_5 = arith.constant 0.000000e+00 : f32
    %11 = vector.broadcast %cst_5 : f32 to vector<8x32xf32>
    %12 = tpu.concatenate %10, %11 in 0 : vector<64x32xf32>, vector<8x32xf32> -> vector<72x32xf32>
    %cst_6 = arith.constant 0.000000e+00 : f32
    %13 = vector.broadcast %cst_6 : f32 to vector<8x32xf32>
    %14 = vector.shape_cast %5 : vector<1x32xf32> to vector<1x32xf32>
    %15 = vector.broadcast %14 : vector<1x32xf32> to vector<64x32xf32>
    %16 = tpu.concatenate %13, %15 in 0 : vector<8x32xf32>, vector<64x32xf32> -> vector<72x32xf32>
    %17 = tpu.concatenate %12, %16 in 1 : vector<72x32xf32>, vector<72x32xf32> -> vector<72x64xf32>
    %cst_7 = arith.constant 0.000000e+00 : f32
    %18 = vector.broadcast %cst_7 : f32 to vector<8x64xf32>
    %cst_8 = arith.constant dense<0.000000e+00> : vector<8x64xf32>
    %19 = tpu.matmul %18, %1, %cst_8 {dimension_numbers = #tpu.dot_dimension_numbers<[1], [0], [0], [1], [0, 0, 1, 1], [], []>} : vector<8x64xf32>, vector<64x64xf32>, vector<8x64xf32> -> vector<8x64xf32>
    %20 = vector.extract_strided_slice %17 {offsets = [0, 0], sizes = [8, 64], strides = [1, 1]} : vector<72x64xf32> to vector<8x64xf32>
    %21 = arith.addf %19, %20 : vector<8x64xf32>
    %22 = math.tanh %21 : vector<8x64xf32>
    %cst_9 = arith.constant dense<0.000000e+00> : vector<8x64xf32>
    %23 = tpu.matmul %22, %1, %cst_9 {dimension_numbers = #tpu.dot_dimension_numbers<[1], [0], [0], [1], [0, 0, 1, 1], [], []>} : vector<8x64xf32>, vector<64x64xf32>, vector<8x64xf32> -> vector<8x64xf32>
    %24 = vector.extract_strided_slice %17 {offsets = [8, 0], sizes = [8, 64], strides = [1, 1]} : vector<72x64xf32> to vector<8x64xf32>
    %25 = arith.addf %23, %24 : vector<8x64xf32>
    %26 = math.tanh %25 : vector<8x64xf32>
    %cst_10 = arith.constant dense<0.000000e+00> : vector<8x64xf32>
    %27 = tpu.matmul %26, %1, %cst_10 {dimension_numbers = #tpu.dot_dimension_numbers<[1], [0], [0], [1], [0, 0, 1, 1], [], []>} : vector<8x64xf32>, vector<64x64xf32>, vector<8x64xf32> -> vector<8x64xf32>
    %28 = vector.extract_strided_slice %17 {offsets = [16, 0], sizes = [8, 64], strides = [1, 1]} : vector<72x64xf32> to vector<8x64xf32>
    %29 = arith.addf %27, %28 : vector<8x64xf32>
    %30 = math.tanh %29 : vector<8x64xf32>
    %cst_11 = arith.constant dense<0.000000e+00> : vector<8x64xf32>
    %31 = tpu.matmul %30, %1, %cst_11 {dimension_numbers = #tpu.dot_dimension_numbers<[1], [0], [0], [1], [0, 0, 1, 1], [], []>} : vector<8x64xf32>, vector<64x64xf32>, vector<8x64xf32> -> vector<8x64xf32>
    %32 = vector.extract_strided_slice %17 {offsets = [24, 0], sizes = [8, 64], strides = [1, 1]} : vector<72x64xf32> to vector<8x64xf32>
    %33 = arith.addf %31, %32 : vector<8x64xf32>
    %34 = math.tanh %33 : vector<8x64xf32>
    %cst_12 = arith.constant dense<0.000000e+00> : vector<8x64xf32>
    %35 = tpu.matmul %34, %1, %cst_12 {dimension_numbers = #tpu.dot_dimension_numbers<[1], [0], [0], [1], [0, 0, 1, 1], [], []>} : vector<8x64xf32>, vector<64x64xf32>, vector<8x64xf32> -> vector<8x64xf32>
    %36 = vector.extract_strided_slice %17 {offsets = [32, 0], sizes = [8, 64], strides = [1, 1]} : vector<72x64xf32> to vector<8x64xf32>
    %37 = arith.addf %35, %36 : vector<8x64xf32>
    %38 = math.tanh %37 : vector<8x64xf32>
    %cst_13 = arith.constant dense<0.000000e+00> : vector<8x64xf32>
    %39 = tpu.matmul %38, %1, %cst_13 {dimension_numbers = #tpu.dot_dimension_numbers<[1], [0], [0], [1], [0, 0, 1, 1], [], []>} : vector<8x64xf32>, vector<64x64xf32>, vector<8x64xf32> -> vector<8x64xf32>
    %40 = vector.extract_strided_slice %17 {offsets = [40, 0], sizes = [8, 64], strides = [1, 1]} : vector<72x64xf32> to vector<8x64xf32>
    %41 = arith.addf %39, %40 : vector<8x64xf32>
    %42 = math.tanh %41 : vector<8x64xf32>
    %cst_14 = arith.constant dense<0.000000e+00> : vector<8x64xf32>
    %43 = tpu.matmul %42, %1, %cst_14 {dimension_numbers = #tpu.dot_dimension_numbers<[1], [0], [0], [1], [0, 0, 1, 1], [], []>} : vector<8x64xf32>, vector<64x64xf32>, vector<8x64xf32> -> vector<8x64xf32>
    %44 = vector.extract_strided_slice %17 {offsets = [48, 0], sizes = [8, 64], strides = [1, 1]} : vector<72x64xf32> to vector<8x64xf32>
    %45 = arith.addf %43, %44 : vector<8x64xf32>
    %46 = math.tanh %45 : vector<8x64xf32>
    %cst_15 = arith.constant dense<0.000000e+00> : vector<8x64xf32>
    %47 = tpu.matmul %46, %1, %cst_15 {dimension_numbers = #tpu.dot_dimension_numbers<[1], [0], [0], [1], [0, 0, 1, 1], [], []>} : vector<8x64xf32>, vector<64x64xf32>, vector<8x64xf32> -> vector<8x64xf32>
    %48 = vector.extract_strided_slice %17 {offsets = [56, 0], sizes = [8, 64], strides = [1, 1]} : vector<72x64xf32> to vector<8x64xf32>
    %49 = arith.addf %47, %48 : vector<8x64xf32>
    %50 = math.tanh %49 : vector<8x64xf32>
    %51 = vector.extract_strided_slice %50 {offsets = [0, 0], sizes = [8, 32], strides = [1, 1]} : vector<8x64xf32> to vector<8x32xf32>
    %cst_16 = arith.constant dense<0.000000e+00> : vector<8x64xf32>
    %52 = tpu.matmul %50, %1, %cst_16 {dimension_numbers = #tpu.dot_dimension_numbers<[1], [0], [0], [1], [0, 0, 1, 1], [], []>} : vector<8x64xf32>, vector<64x64xf32>, vector<8x64xf32> -> vector<8x64xf32>
    %53 = vector.extract_strided_slice %17 {offsets = [64, 0], sizes = [8, 64], strides = [1, 1]} : vector<72x64xf32> to vector<8x64xf32>
    %54 = arith.addf %52, %53 : vector<8x64xf32>
    %55 = math.tanh %54 : vector<8x64xf32>
    %56 = vector.extract_strided_slice %55 {offsets = [0, 32], sizes = [8, 32], strides = [1, 1]} : vector<8x64xf32> to vector<8x32xf32>
    %57 = tpu.concatenate %51, %56 in 0 : vector<8x32xf32>, vector<8x32xf32> -> vector<16x32xf32>
    %58 = vector.broadcast %6 : vector<1x32xf32> to vector<16x32xf32>
    %59 = arith.mulf %57, %58 : vector<16x32xf32>
    %cst_17 = arith.constant dense<0.000000e+00> : vector<16xf32>
    %60 = vector.multi_reduction <add>, %59, %cst_17 [1] : vector<16x32xf32> to vector<16xf32>
    %61 = vector.shape_cast %60 : vector<16xf32> to vector<16x1xf32>
    %62 = vector.broadcast %7 : vector<1x1xf32> to vector<16x1xf32>
    %63 = arith.addf %61, %62 : vector<16x1xf32>
    %c0_18 = arith.constant 0 : index
    %c0_19 = arith.constant 0 : index
    %64 = vector.load %arg3[%c0_18, %c0_19] : memref<16x1xf32, #tpu.memory_space<vmem>>, vector<16x1xf32>
    tpu.vector_store %arg3[%c0_18, %c0_19], %63 {strides = array<i32>} : memref<16x1xf32, #tpu.memory_space<vmem>>, vector<16x1xf32>,
    return
  }
}

</mosaic_0001>

<bundles_post_ra>
// kernel: rnn_forward.1
= control target key start
LH: loop header
LB: loop body
LE: loop exit
PB: predicated region body
PF: predicated region fallthrough
CT: control target
= control target key end

     0   :  { %v395_v2 = vmov 0.0   ;;  %s396_s16 = smov 32   ;;  %vm34_vm0 = vcmask 130048   ;;  %vm109_vm1 = vcmask 261120   ;;  %vm119_vm2 = vcmask 523264   ;;  %s624_s1 = inlined_call_operand.vmem [shape: f32[64,64], index: 1, kind: input, shape index: {}]   ;;  %s625_s2 = inlined_call_operand.vmem [shape: f32[20,32], index: 2, kind: input, shape index: {}]   ;;  %s626_s0 = inlined_call_operand.vmem [shape: f32[64,16], index: 0, kind: input, shape index: {}]   ;;  %s627_s3 = inlined_call_operand.vmem [shape: f32[16,1], index: 3, kind: output, shape index: {}]  }
   0x1   :  { %v421_v0 = vld [vmem:[%s624_s1 + $0x38] sm:$0xff]  ;;  %v426_v1 = vld [vmem:[%s624_s1 + $0x30] sm:$0xff]  ;;  %103 = vrot.lane.b32.xlu0 %v395_v2, %s396_s16  ;;  %v31_v3 = vld [vmem:[%s625_s2 + $0x8] sm:$0xff]  ;;  %vm351_vm3 = vcmask 7168  }
   0x2   :  { %130 = vmatpush.msra.mxu1 %v421_v0  ;;  %154 = vmatpush.msra.mxu2 %v421_v0  ;;  %v437_v4 = vld [vmem:[%s624_s1 + $0x28] sm:$0xff]  ;;  %v30_v5 = vld [vmem:[%s625_s2] sm:$0xff]  ;;  %v459_v8 = vld [vmem:[%s624_s1 + $0x18] sm:$0xff] }
   0x3   :  { %73 = vmatpush.msra.mxu0 %v31_v3  ;;  %178 = vmatpush.msra.mxu3 %v421_v0  ;;  %v14_v6 = vld [vmem:[%s626_s0] sm:$0xff]  ;;  %v467_v9 = vld [vmem:[%s624_s1 + $0x10] sm:$0xff]  ;;  %v475_v10 = vld [vmem:[%s624_s1 + $0x8] sm:$0xff] }
   0x4   :  { %131 = vmatpush.msra.mxu1 %v426_v1  ;;  %155 = vmatpush.msra.mxu2 %v426_v1  ;;  %v451_v7 = vld [vmem:[%s624_s1 + $0x20] sm:$0xff]  ;;  %v15_v11 = vld [vmem:[%s626_s0 + $0x8] sm:$0xff]  ;;  %v16_v13 = vld [vmem:[%s626_s0 + $0x10] sm:$0xff] }
   0x5   :  { %74 = vmatpush.msra.mxu0 %v30_v5  ;;  %179 = vmatpush.msra.mxu3 %v426_v1  ;;  %v486_v12 = vld [vmem:[%s624_s1] sm:$0xff]  ;;  %v17_v14 = vld [vmem:[%s626_s0 + $0x18] sm:$0xff]  ;;  %v19_v16 = vld [vmem:[%s626_s0 + $0x28] sm:$0xff] }
   0x6   :  { %132 = vmatpush.msra.mxu1 %v437_v4  ;;  %358 = vmatmul.msk.f32.vlgmr.msra.gmra.mxu0 %vm34_vm0, %v14_v6  ;;  %v18_v15 = vld [vmem:[%s626_s0 + $0x20] sm:$0xff]  ;;  %v20_v17 = vld [vmem:[%s626_s0 + $0x30] sm:$0xff]  ;;  %v21_v19 = vld [vmem:[%s626_s0 + $0x38] sm:$0xff]  ;;  %s397_s0 = smov 96  }
   0x7   :  { %156 = vmatpush.msra.mxu2 %v437_v4  ;;  %180 = vmatpush.msra.mxu3 %v437_v4  ;;  %v552_v18 = vld [vmem:[%s625_s2 + $0x10] sm:$0xf] }
   0x8   :  { %133 = vmatpush.msra.mxu1 %v451_v7  ;;  %v100_v20 = vperm.slane %v552_v18, 1  ;;  %v561_v21 = vperm.slane %v552_v18, 0 }
   0x9   :  { %157 = vmatpush.msra.mxu2 %v451_v7  ;;  %181 = vmatpush.msra.mxu3 %v451_v7 }
   0xa   :  { %134 = vmatpush.msra.mxu1 %v459_v8  ;;  %105 = vrot.lane.b32.xlu0 %v100_v20, %s396_s16 }
   0xb   :  { %158 = vmatpush.msra.mxu2 %v459_v8  ;;  %182 = vmatpush.msra.mxu3 %v459_v8 }
   0xc   :  { %135 = vmatpush.msra.mxu1 %v467_v9 }
   0xd   :  { %159 = vmatpush.msra.mxu2 %v467_v9  ;;  %183 = vmatpush.msra.mxu3 %v467_v9 }
   0xe   :  { %136 = vmatpush.msra.mxu1 %v475_v10  ;;  %359 = vmatmul.msk.f32.gmra.mxu0 %vm34_vm0, %v15_v11 }
   0xf   :  { %160 = vmatpush.msra.mxu2 %v475_v10  ;;  %184 = vmatpush.msra.mxu3 %v475_v10 }
  0x10   :  { %137 = vmatpush.msra.mxu1 %v486_v12 }
  0x11   :  { %138 = vmatmul.f32.vlgmr.msra.gmra.mxu1 %v395_v2  ;;  %161 = vmatpush.msra.mxu2 %v486_v12 }
  0x12   :  { %185 = vmatpush.msra.mxu3 %v486_v12  ;;  %202 = vmatpush.msrb.mxu1 %v421_v0 }
  0x13   :  { %226 = vmatpush.msrb.mxu2 %v421_v0 }
  0x14   :  { %250 = vmatpush.msrb.mxu3 %v421_v0  ;;  %203 = vmatpush.msrb.mxu1 %v426_v1 }
  0x15   :  { %227 = vmatpush.msrb.mxu2 %v426_v1 }
  0x16   :  { %251 = vmatpush.msrb.mxu3 %v426_v1  ;;  %360 = vmatmul.msk.f32.gmra.mxu0 %vm34_vm0, %v16_v13 }
  0x17   :  { %204 = vmatpush.msrb.mxu1 %v437_v4  ;;  %228 = vmatpush.msrb.mxu2 %v437_v4 }
  0x18   :  { %252 = vmatpush.msrb.mxu3 %v437_v4 }
  0x19   :  { %205 = vmatpush.msrb.mxu1 %v451_v7  ;;  %229 = vmatpush.msrb.mxu2 %v451_v7 }
  0x1a   :  { %253 = vmatpush.msrb.mxu3 %v451_v7 }
  0x1b   :  { %206 = vmatpush.msrb.mxu1 %v459_v8  ;;  %230 = vmatpush.msrb.mxu2 %v459_v8 }
  0x1c   :  { %254 = vmatpush.msrb.mxu3 %v459_v8 }
  0x1d   :  { %207 = vmatpush.msrb.mxu1 %v467_v9  ;;  %231 = vmatpush.msrb.mxu2 %v467_v9 }
  0x1e   :  { %255 = vmatpush.msrb.mxu3 %v467_v9  ;;  %361 = vmatmul.msk.f32.gmra.mxu0 %vm34_vm0, %v17_v14 }
  0x1f   :  { %208 = vmatpush.msrb.mxu1 %v475_v10  ;;  %232 = vmatpush.msrb.mxu2 %v475_v10 }
  0x20   :  { %256 = vmatpush.msrb.mxu3 %v475_v10 }
  0x21   :  { %209 = vmatpush.msrb.mxu1 %v486_v12  ;;  %233 = vmatpush.msrb.mxu2 %v486_v12 }
  0x22   :  { %257 = vmatpush.msrb.mxu3 %v486_v12 }
  0x23   :  { %274 = vmatpush.msra.mxu1 %v421_v0 }
  0x25   :  { %275 = vmatpush.msra.mxu1 %v426_v1 }
  0x26   :  { %362 = vmatmul.msk.f32.gmra.mxu0 %vm34_vm0, %v18_v15 }
  0x27   :  { %276 = vmatpush.msra.mxu1 %v437_v4 }
  0x29   :  { %277 = vmatpush.msra.mxu1 %v451_v7 }
  0x2b   :  { %278 = vmatpush.msra.mxu1 %v459_v8 }
  0x2d   :  { %279 = vmatpush.msra.mxu1 %v467_v9 }
  0x2e   :  { %363 = vmatmul.msk.f32.gmra.mxu0 %vm34_vm0, %v19_v16 }
  0x2f   :  { %280 = vmatpush.msra.mxu1 %v475_v10 }
  0x31   :  { %281 = vmatpush.msra.mxu1 %v486_v12 }
  0x36   :  { %364 = vmatmul.msk.f32.gmra.mxu0 %vm34_vm0, %v20_v17 }
  0x3e   :  { %365 = vmatmul.msk.f32.gmra.mxu0 %vm34_vm0, %v21_v19  ;;  %v348_v19 = vperm.slane %v552_v18, 3 }
  0x73   :  { %v104_v24 = vpop.permute.xlu0 %103 }
  0x7c   :  { %v575_v31 = vpop.permute.xlu0 %105 }
  0x83   :  { %v76_v22 = vpop.f32.mrf.mxu0 }
  0x84   :  { %v77_v23 = vadd.f32 %v76_v22, %v561_v21 }
  0x86   :  { %v110_v25 = vsel %vm109_vm1, %v77_v23, %v104_v24 }
  0x8b   :  { %v79_v29 = vpop.f32.mrf.mxu0 }
  0x8c   :  { %v80_v30 = vadd.f32 %v79_v29, %v561_v21 }
  0x8e   :  { %v139_v26 = vpop.f32.mrf.mxu1  ;;  %v111_v32 = vsel %vm109_vm1, %v80_v30, %v575_v31 }
  0x8f   :  { %v140_v27 = vadd.f32 %v139_v26, %v110_v25 }
  0x91   :  { %377 = vtanh.f32 %v140_v27 }
  0x93   :  { %v82_v36 = vpop.f32.mrf.mxu0 }
  0x94   :  { %v83_v37 = vadd.f32 %v82_v36, %v561_v21 }
  0x96   :  { %v112_v38 = vsel %vm109_vm1, %v83_v37, %v575_v31 }
  0x97   :  { %v378_v28 = vpop.eup %377 }
  0x98   :  { %366 = vmatmul.msk.f32.vlgmr.msra.gmra.mxu2 %vm119_vm2, %v378_v28 }
  0x99   :  { %298 = vmatpush.msra.mxu2 %v421_v0 }
  0x9b   :  { %299 = vmatpush.msra.mxu2 %v426_v1  ;;  %v85_v42 = vpop.f32.mrf.mxu0 }
  0x9c   :  { %v86_v43 = vadd.f32 %v85_v42, %v561_v21 }
  0x9d   :  { %300 = vmatpush.msra.mxu2 %v437_v4 }
  0x9e   :  { %v113_v44 = vsel %vm109_vm1, %v86_v43, %v575_v31 }
  0x9f   :  { %301 = vmatpush.msra.mxu2 %v451_v7 }
  0xa1   :  { %302 = vmatpush.msra.mxu2 %v459_v8 }
  0xa3   :  { %303 = vmatpush.msra.mxu2 %v467_v9  ;;  %v88_v48 = vpop.f32.mrf.mxu0 }
  0xa4   :  { %v89_v49 = vadd.f32 %v88_v48, %v561_v21 }
  0xa5   :  { %304 = vmatpush.msra.mxu2 %v475_v10 }
  0xa6   :  { %v114_v50 = vsel %vm109_vm1, %v89_v49, %v575_v31 }
  0xa7   :  { %305 = vmatpush.msra.mxu2 %v486_v12 }
  0xab   :  { %v91_v54 = vpop.f32.mrf.mxu0 }
  0xac   :  { %v92_v55 = vadd.f32 %v91_v54, %v561_v21 }
  0xae   :  { %v115_v56 = vsel %vm109_vm1, %v92_v55, %v575_v31 }
  0xb3   :  { %v94_v60 = vpop.f32.mrf.mxu0 }
  0xb4   :  { %v95_v61 = vadd.f32 %v94_v60, %v561_v21 }
  0xb6   :  { %v116_v62 = vsel %vm109_vm1, %v95_v61, %v575_v31 }
  0xbb   :  { %v97_v2 = vpop.f32.mrf.mxu0 }
  0xbc   :  { %v98_v3 = vadd.f32 %v97_v2, %v561_v21 }
 0x11b   :  { %v163_v33 = vpop.f32.mrf.mxu2 }
 0x11c   :  { %v164_v34 = vadd.f32 %v163_v33, %v111_v32 }
 0x11e   :  { %379 = vtanh.f32 %v164_v34 }
 0x124   :  { %v380_v35 = vpop.eup %379 }
 0x125   :  { %367 = vmatmul.msk.f32.vlgmr.msra.gmra.mxu3 %vm119_vm2, %v380_v35 }
 0x126   :  { %322 = vmatpush.msra.mxu3 %v421_v0 }
 0x128   :  { %323 = vmatpush.msra.mxu3 %v426_v1 }
 0x12a   :  { %324 = vmatpush.msra.mxu3 %v437_v4  ;;  %v117_v4 = vsel %vm109_vm1, %v98_v3, %v575_v31 }
 0x12c   :  { %325 = vmatpush.msra.mxu3 %v451_v7 }
 0x12e   :  { %326 = vmatpush.msra.mxu3 %v459_v8  ;;  %v118_v8 = vsel %vm109_vm1, 0.0, %v575_v31 }
 0x130   :  { %327 = vmatpush.msra.mxu3 %v467_v9 }
 0x132   :  { %328 = vmatpush.msra.mxu3 %v475_v10 }
 0x134   :  { %329 = vmatpush.msra.mxu3 %v486_v12  ;;  %v339_v12 = vperm.slane %v552_v18, 2 }
 0x1a8   :  { %v187_v39 = vpop.f32.mrf.mxu3 }
 0x1a9   :  { %v188_v40 = vadd.f32 %v187_v39, %v112_v38 }
 0x1ab   :  { %381 = vtanh.f32 %v188_v40 }
 0x1b1   :  { %v382_v41 = vpop.eup %381 }
 0x1b2   :  { %368 = vmatmul.msk.f32.vlgmr.msrb.gmra.mxu1 %vm119_vm2, %v382_v41 }
 0x22f   :  { %v211_v45 = vpop.f32.mrf.mxu1 }
 0x230   :  { %v212_v46 = vadd.f32 %v211_v45, %v113_v44 }
 0x232   :  { %383 = vtanh.f32 %v212_v46 }
 0x238   :  { %v384_v47 = vpop.eup %383 }
 0x239   :  { %369 = vmatmul.msk.f32.vlgmr.msrb.gmra.mxu2 %vm119_vm2, %v384_v47 }
 0x2bc   :  { %v235_v51 = vpop.f32.mrf.mxu2 }
 0x2bd   :  { %v236_v52 = vadd.f32 %v235_v51, %v114_v50 }
 0x2bf   :  { %385 = vtanh.f32 %v236_v52 }
 0x2c5   :  { %v386_v53 = vpop.eup %385 }
 0x2c6   :  { %370 = vmatmul.msk.f32.vlgmr.msrb.gmra.mxu3 %vm119_vm2, %v386_v53 }
 0x349   :  { %v259_v57 = vpop.f32.mrf.mxu3 }
 0x34a   :  { %v260_v58 = vadd.f32 %v259_v57, %v115_v56 }
 0x34c   :  { %387 = vtanh.f32 %v260_v58 }
 0x352   :  { %v388_v59 = vpop.eup %387 }
 0x353   :  { %371 = vmatmul.msk.f32.vlgmr.msra.gmra.mxu1 %vm119_vm2, %v388_v59 }
 0x3d0   :  { %v283_v63 = vpop.f32.mrf.mxu1 }
 0x3d1   :  { %v284_v0 = vadd.f32 %v283_v63, %v116_v62 }
 0x3d3   :  { %389 = vtanh.f32 %v284_v0 }
 0x3d9   :  { %v390_v1 = vpop.eup %389 }
 0x3da   :  { %372 = vmatmul.msk.f32.vlgmr.msra.gmra.mxu2 %vm119_vm2, %v390_v1 }
 0x45d   :  { %v307_v5 = vpop.f32.mrf.mxu2 }
 0x45e   :  { %v308_v6 = vadd.f32 %v307_v5, %v117_v4 }
 0x460   :  { %391 = vtanh.f32 %v308_v6 }
 0x466   :  { %v392_v7 = vpop.eup %391 }
 0x467   :  { %373 = vmatmul.msk.f32.vlgmr.msra.gmra.mxu3 %vm119_vm2, %v392_v7  ;;  %v340_v13 = vmul.f32 %v392_v7, %v339_v12 }
 0x469   :  { %v342_v14 = vsel %vm109_vm1, %v340_v13, 0.0 }
 0x4ea   :  { %v331_v9 = vpop.f32.mrf.mxu3 }
 0x4eb   :  { %v332_v10 = vadd.f32 %v331_v9, %v118_v8 }
 0x4ed   :  { %393 = vtanh.f32 %v332_v10 }
 0x4f3   :  { %v394_v11 = vpop.eup %393 }
 0x4f4   :  { %336 = vrot.lane.b32.xlu1 %v394_v11, %s397_s0 }
 0x51e   :  { %343 = vadd.xlane.f32.xlu1 %v342_v14 }
 0x566   :  { %v337_v15 = vpop.permute.xlu1 %336 }
 0x567   :  { %v341_v16 = vmul.f32 %v339_v12, %v337_v15 }
 0x569   :  { %v345_v17 = vsel %vm109_vm1, %v341_v16, 0.0 }
 0x56a   :  { %346 = vadd.xlane.f32.xlu2 %v345_v17 }
 0x591   :  { %v344_v20 = vpop.xlane.xlu1 %343 }
 0x592   :  { %v349_v21 = vadd.f32 %v348_v19, %v344_v20 }
 0x594   :  { %352 = vst.msk [vmem:[%s627_s3] sm:$0xff] %vm351_vm3, %v349_v21 }
 0x5dd   :  { %v347_v22 = vpop.xlane.xlu2 %346 }
 0x5de   :  { %v350_v23 = vadd.f32 %v348_v19, %v347_v22 }
 0x5e0   :  { %353 = vst.msk [vmem:[%s627_s3 + $0x8] sm:$0xff] %vm351_vm3, %v350_v23 }

</bundles_post_ra>
